<compile_context>
chip_gen: v6e
topology: v6e:2x2x1
jax: 0.10.0
libtpu: 0.0.40
codegen_flags: <defaults>
</compile_context>

<pallas_src>
import functools

import jax
import jax.numpy as jnp
from jax import lax
from jax.experimental import pallas as pl
from jax.experimental.pallas import tpu as pltpu

_EPS = 1e-6  # nn.PairwiseDistance default eps (added to the difference before the norm)


def _contrastive_kernel(fp_ref, ap_ref, fn_ref, an_ref, out_ref, *,
                        alpha, tile_rows, rows_in_last_tile):
    # (TB, D) tiles in VMEM; VPU/XLU/EUP only, no MXU.
    fp = fp_ref[...].astype(jnp.float32)
    ap = ap_ref[...].astype(jnp.float32)

    # Positive branch first (its tile-sized diff dies before the negative
    # branch materializes its own -> lower peak VMEM for big tiles).
    diff_pos = fp - ap + _EPS
    pos_part = jnp.sum(diff_pos * diff_pos, axis=-1, keepdims=True)      # (TB, 1)

    fn = fn_ref[...].astype(jnp.float32)
    an = an_ref[...].astype(jnp.float32)
    diff_neg = fn - an + _EPS
    sq_neg = jnp.sum(diff_neg * diff_neg, axis=-1, keepdims=True)        # (TB, 1)
    dist_neg = jnp.sqrt(sq_neg)
    margin = jnp.maximum(alpha - dist_neg, 0.0)
    neg_part = margin * margin                                           # (TB, 1)

    contrib = pos_part + neg_part                                        # (TB, 1)

    # Lane-dense (8, 128) output block: tile partial sum at [0, 0], zeros else.
    r = lax.broadcasted_iota(jnp.int32, (8, 128), 0)
    c = lax.broadcasted_iota(jnp.int32, (8, 128), 1)
    corner = (r == 0) & (c == 0)

    def _write(total):
        out_ref[...] = jnp.where(corner, total, 0.0)

    if rows_in_last_tile == tile_rows:
        # Exact tiling: straight-line path, no masking work at all.
        _write(jnp.sum(contrib))
    else:
        is_last = pl.program_id(0) == pl.num_programs(0) - 1

        @pl.when(jnp.logical_not(is_last))
        def _():
            _write(jnp.sum(contrib))

        @pl.when(is_last)
        def _():
            # Select (not multiply) so NaN/Inf garbage in OOB rows can't leak.
            row = lax.broadcasted_iota(jnp.int32, (tile_rows, 1), 0)
            masked = jnp.where(row < rows_in_last_tile, contrib, 0.0)
            _write(jnp.sum(masked))


def _generation_budgets():
    """Return (input_buffer_budget_bytes, vmem_limit_bytes) for this chip."""
    try:
        vmem_cap = int(pltpu.get_tpu_info().vmem_capacity_bytes)
    except Exception:
        # Unknown chip: conservative settings that fit every generation's
        # scoped VMEM (v5e 16 MiB default, v6e/v7x 32 MiB default).
        return 8 * 1024 * 1024, 32 * 1024 * 1024
    if vmem_cap <= 80 * 1024 * 1024:
        # v7x-class: 64 MiB physical VMEM per TC, ~3.2 TB/s HBM.  Big tiles to
        # amortize step overhead, but leave >=20 MiB for Mosaic intermediates.
        return 16 * 1024 * 1024, 44 * 1024 * 1024
    # v5e / v6e: 128 MiB physical VMEM -> plenty of headroom.
    return 16 * 1024 * 1024, 48 * 1024 * 1024


def _choose_tile_rows(batch, dim, dtype, budget_bytes):
    itemsize = jnp.dtype(dtype).itemsize
    # Dtype-aware sublane multiple: 8 rows f32, 16 bf16/f16, 32 int8/fp8.
    sublane = max(8, 32 // itemsize)
    if batch <= sublane:
        return batch                      # full-batch block: always legal

    # Bytes-based cap (no fixed row cap): 4 input streams x 2 pipeline buffers.
    per_row_bytes = 4 * 2 * dim * itemsize
    tb = budget_bytes // max(per_row_bytes, 1)
    # Keep at least 2 grid tiles so the v7x megacore gets both TensorCores
    # streaming HBM (harmless on single-TC v5e/v6e).
    tb = min(tb, pl.cdiv(batch, 2))
    tb = max((tb // sublane) * sublane, sublane)
    return min(tb, batch)


def contrastive_loss(positive_pairs, negative_pairs, *, batch_size, alpha,
                     tile_rows=None):
    face_pos, audio_pos = positive_pairs
    face_neg, audio_neg = negative_pairs
    B, D = face_pos.shape
    dtype = face_pos.dtype
    itemsize = jnp.dtype(dtype).itemsize

    input_budget, vmem_limit = _generation_budgets()
    if tile_rows is not None:
        tb = max(min(int(tile_rows), B), 1)
    else:
        tb = _choose_tile_rows(B, D, dtype, input_budget)

    num_tiles = pl.cdiv(B, tb)
    rows_in_last = B - (num_tiles - 1) * tb

    kernel = functools.partial(
        _contrastive_kernel, alpha=float(alpha),
        tile_rows=tb, rows_in_last_tile=rows_in_last)

    in_spec = pl.BlockSpec((tb, D), lambda i: (i, 0))
    # Lane-dense per-tile partial sums: one (8, 128) block per grid step.
    out_spec = pl.BlockSpec((8, 128), lambda i: (i, 0))

    cost = pl.CostEstimate(
        flops=2 * (4 * B * D + 3 * B),          # rough; kernel is mem-bound anyway
        transcendentals=B,                      # one sqrt per negative row
        bytes_accessed=4 * B * D * itemsize + num_tiles * 8 * 128 * 4,
    )

    partials = pl.pallas_call(
        kernel,
        out_shape=jax.ShapeDtypeStruct((num_tiles * 8, 128), jnp.float32),
        grid=(num_tiles,),
        in_specs=[in_spec] * 4,
        out_specs=out_spec,
        compiler_params=pltpu.CompilerParams(
            dimension_semantics=("parallel",),   # independent tiles -> both TCs on v7x
            vmem_limit_bytes=vmem_limit,
        ),
        cost_estimate=cost,
    )(face_pos, audio_pos, face_neg, audio_neg)

    # Every non-[0,0] element of each (8,128) block is exactly 0, so a plain
    # sum over the tiny (num_tiles*8, 128) array is safe and cheap.
    return jnp.sum(partials) / (2.0 * batch_size)


def _reference(positive_pairs, negative_pairs, *, batch_size, alpha):
    face_pos, audio_pos = positive_pairs
    face_neg, audio_neg = negative_pairs
    dp = jnp.sqrt(jnp.sum((face_pos - audio_pos + _EPS) ** 2, axis=-1))
    dn = jnp.sqrt(jnp.sum((face_neg - audio_neg + _EPS) ** 2, axis=-1))
    pos_part = dp ** 2
    neg_part = jnp.clip(alpha - dn, 0.0, None) ** 2
    return (pos_part.sum() + neg_part.sum()) / (2.0 * batch_size)


if __name__ == "__main__":
    alpha = 1.0
    key = jax.random.PRNGKey(0)

    # --- Case 1: module-spec small shapes (single full-batch tile). ---
    batch_size, hidden = 2, 32
    k1, k2, k3, k4 = jax.random.split(key, 4)
    face_pos = jax.random.normal(k1, (batch_size, hidden), dtype=jnp.float32)
    audio_pos = jax.random.normal(k2, (batch_size, hidden), dtype=jnp.float32)
    face_neg = jax.random.normal(k3, (batch_size, hidden), dtype=jnp.float32)
    audio_neg = jax.random.normal(k4, (batch_size, hidden), dtype=jnp.float32)

    loss = contrastive_loss((face_pos, audio_pos), (face_neg, audio_neg),
                            batch_size=batch_size, alpha=alpha)
    loss = jax.block_until_ready(loss)
    ref = _reference((face_pos, audio_pos), (face_neg, audio_neg),
                     batch_size=batch_size, alpha=alpha)
    assert jnp.allclose(loss, ref, rtol=1e-5, atol=1e-6), (loss, ref)

    # --- Case 2: explicit tile_rows -> tiled grid + ragged-last-tile masking. ---
    B2, D2 = 20, 32
    k5, k6, k7, k8 = jax.random.split(jax.random.PRNGKey(1), 4)
    fp2 = jax.random.normal(k5, (B2, D2), dtype=jnp.float32)
    ap2 = jax.random.normal(k6, (B2, D2), dtype=jnp.float32)
    fn2 = jax.random.normal(k7, (B2, D2), dtype=jnp.float32)
    an2 = jax.random.normal(k8, (B2, D2), dtype=jnp.float32)

    loss2 = contrastive_loss((fp2, ap2), (fn2, an2),
                             batch_size=B2, alpha=alpha, tile_rows=8)
    loss2 = jax.block_until_ready(loss2)
    ref2 = _reference((fp2, ap2), (fn2, an2), batch_size=B2, alpha=alpha)
    assert jnp.allclose(loss2, ref2, rtol=1e-5, atol=1e-6), (loss2, ref2)

    # --- Case 3: automatic tile selection (>=2 tiles, exact tiling path). ---
    B3, D3 = 24, 128
    k9, k10, k11, k12 = jax.random.split(jax.random.PRNGKey(2), 4)
    fp3 = jax.random.normal(k9, (B3, D3), dtype=jnp.float32)
    ap3 = jax.random.normal(k10, (B3, D3), dtype=jnp.float32)
    fn3 = jax.random.normal(k11, (B3, D3), dtype=jnp.float32)
    an3 = jax.random.normal(k12, (B3, D3), dtype=jnp.float32)

    loss3 = contrastive_loss((fp3, ap3), (fn3, an3), batch_size=B3, alpha=alpha)
    loss3 = jax.block_until_ready(loss3)
    ref3 = _reference((fp3, ap3), (fn3, an3), batch_size=B3, alpha=alpha)
    assert jnp.allclose(loss3, ref3, rtol=1e-5, atol=1e-6), (loss3, ref3)

    print("KERNEL_OK")
</pallas_src>

<mosaic_0001>
module attributes {stable_mosaic.version = 11 : i64} {
  func.func @_contrastive_kernel(%arg0: i32, %arg1: memref<2x32xf32, #tpu.memory_space<vmem>>, %arg2: memref<2x32xf32, #tpu.memory_space<vmem>>, %arg3: memref<2x32xf32, #tpu.memory_space<vmem>>, %arg4: memref<2x32xf32, #tpu.memory_space<vmem>>, %arg5: memref<8x128xf32, #tpu.memory_space<vmem>>) attributes {dimension_semantics = [#tpu.dimension_semantics<parallel>], iteration_bounds = array<i64: 1>, scalar_prefetch = 0 : i64, scratch_operands = 0 : i64, tpu.core_type = #tpu.core_type<tc>, window_params = [{transform_indices = @transform_0, window_bounds = array<i64: 2, 32>}, {transform_indices = @transform_1, window_bounds = array<i64: 2, 32>}, {transform_indices = @transform_2, window_bounds = array<i64: 2, 32>}, {transform_indices = @transform_3, window_bounds = array<i64: 2, 32>}, {transform_indices = @transform_4, window_bounds = array<i64: 8, 128>}]} {
    %c0 = arith.constant 0 : index
    %c0_0 = arith.constant 0 : index
    %0 = vector.load %arg1[%c0, %c0_0] : memref<2x32xf32, #tpu.memory_space<vmem>>, vector<2x32xf32>
    %c0_1 = arith.constant 0 : index
    %c0_2 = arith.constant 0 : index
    %1 = vector.load %arg2[%c0_1, %c0_2] : memref<2x32xf32, #tpu.memory_space<vmem>>, vector<2x32xf32>
    %2 = arith.subf %0, %1 : vector<2x32xf32>
    %cst = arith.constant 9.99999997E-7 : f32
    %3 = vector.broadcast %cst : f32 to vector<2x32xf32>
    %4 = arith.addf %2, %3 : vector<2x32xf32>
    %5 = arith.mulf %4, %4 : vector<2x32xf32>
    %cst_3 = arith.constant dense<0.000000e+00> : vector<2xf32>
    %6 = vector.multi_reduction <add>, %5, %cst_3 [1] : vector<2x32xf32> to vector<2xf32>
    %7 = vector.shape_cast %6 : vector<2xf32> to vector<2x1xf32>
    %c0_4 = arith.constant 0 : index
    %c0_5 = arith.constant 0 : index
    %8 = vector.load %arg3[%c0_4, %c0_5] : memref<2x32xf32, #tpu.memory_space<vmem>>, vector<2x32xf32>
    %c0_6 = arith.constant 0 : index
    %c0_7 = arith.constant 0 : index
    %9 = vector.load %arg4[%c0_6, %c0_7] : memref<2x32xf32, #tpu.memory_space<vmem>>, vector<2x32xf32>
    %10 = arith.subf %8, %9 : vector<2x32xf32>
    %cst_8 = arith.constant 9.99999997E-7 : f32
    %11 = vector.broadcast %cst_8 : f32 to vector<2x32xf32>
    %12 = arith.addf %10, %11 : vector<2x32xf32>
    %13 = arith.mulf %12, %12 : vector<2x32xf32>
    %cst_9 = arith.constant dense<0.000000e+00> : vector<2xf32>
    %14 = vector.multi_reduction <add>, %13, %cst_9 [1] : vector<2x32xf32> to vector<2xf32>
    %15 = vector.shape_cast %14 : vector<2xf32> to vector<2x1xf32>
    %16 = math.sqrt %15 : vector<2x1xf32>
    %cst_10 = arith.constant 1.000000e+00 : f32
    %17 = vector.broadcast %cst_10 : f32 to vector<2x1xf32>
    %18 = arith.subf %17, %16 : vector<2x1xf32>
    %cst_11 = arith.constant 0.000000e+00 : f32
    %19 = vector.broadcast %cst_11 : f32 to vector<2x1xf32>
    %20 = arith.maximumf %18, %19 : vector<2x1xf32>
    %21 = arith.mulf %20, %20 : vector<2x1xf32>
    %22 = arith.addf %7, %21 : vector<2x1xf32>
    %23 = tpu.iota {dimensions = array<i32: 0>} : vector<8x128xi32>
    %24 = tpu.iota {dimensions = array<i32: 1>} : vector<8x128xi32>
    %c0_i32 = arith.constant 0 : i32
    %25 = vector.broadcast %c0_i32 : i32 to vector<8x128xi32>
    %26 = arith.cmpi eq, %23, %25 : vector<8x128xi32>
    %c0_i32_12 = arith.constant 0 : i32
    %27 = vector.broadcast %c0_i32_12 : i32 to vector<8x128xi32>
    %28 = arith.cmpi eq, %24, %27 : vector<8x128xi32>
    %29 = arith.andi %26, %28 : vector<8x128xi1>
    %30 = vector.shape_cast %22 : vector<2x1xf32> to vector<1x2x1xf32>
    %cst_13 = arith.constant dense<0.000000e+00> : vector<1xf32>
    %31 = vector.multi_reduction <add>, %30, %cst_13 [1, 2] : vector<1x2x1xf32> to vector<1xf32>
    %32 = vector.shape_cast %31 : vector<1xf32> to vector<1x1x1xf32>
    %33 = vector.extract %32[0, 0, 0] : f32 from vector<1x1x1xf32>
    %cst_14 = arith.constant 0.000000e+00 : f32
    %34 = vector.broadcast %33 : f32 to vector<8x128xf32>
    %35 = vector.broadcast %cst_14 : f32 to vector<8x128xf32>
    %36 = arith.select %29, %34, %35 : vector<8x128xi1>, vector<8x128xf32>
    %c0_15 = arith.constant 0 : index
    %c0_16 = arith.constant 0 : index
    %37 = vector.load %arg5[%c0_15, %c0_16] : memref<8x128xf32, #tpu.memory_space<vmem>>, vector<8x128xf32>
    tpu.vector_store %arg5[%c0_15, %c0_16], %36 {strides = array<i32>} : memref<8x128xf32, #tpu.memory_space<vmem>>, vector<8x128xf32>,
    return
  }
  func.func @transform_0(%arg0: i32) -> (i32, i32) {
    %c0_i32 = arith.constant 0 : i32
    %c0_i32_0 = arith.constant 0 : i32
    return %arg0, %c0_i32 : i32, i32
  }
  func.func @transform_1(%arg0: i32) -> (i32, i32) {
    %c0_i32 = arith.constant 0 : i32
    %c0_i32_0 = arith.constant 0 : i32
    return %arg0, %c0_i32 : i32, i32
  }
  func.func @transform_2(%arg0: i32) -> (i32, i32) {
    %c0_i32 = arith.constant 0 : i32
    %c0_i32_0 = arith.constant 0 : i32
    return %arg0, %c0_i32 : i32, i32
  }
  func.func @transform_3(%arg0: i32) -> (i32, i32) {
    %c0_i32 = arith.constant 0 : i32
    %c0_i32_0 = arith.constant 0 : i32
    return %arg0, %c0_i32 : i32, i32
  }
  func.func @transform_4(%arg0: i32) -> (i32, i32) {
    %c0_i32 = arith.constant 0 : i32
    %c0_i32_0 = arith.constant 0 : i32
    return %arg0, %c0_i32 : i32, i32
  }
}

</mosaic_0001>

<bundles_post_ra>
// kernel: tpu_custom_call.1
= control target key start
LH: loop header
LB: loop body
LE: loop exit
PB: predicated region body
PF: predicated region fallthrough
CT: control target
= control target key end

     0   :  { %9 = vsyncpa [#allocation3], 0  ;;  %s223_s0 = inlined_call_operand.hbm [shape: f32[2,32], index: 0, kind: input, shape index: {}]   ;;  %s224_s1 = inlined_call_operand.hbm [shape: f32[2,32], index: 1, kind: input, shape index: {}]   ;;  %s225_s2 = inlined_call_operand.vmem [shape: f32[2,32], index: 2, kind: input, shape index: {}]   ;;  %s226_s3 = inlined_call_operand.vmem [shape: f32[2,32], index: 3, kind: input, shape index: {}]   ;;  %s227_s4 = inlined_call_operand.hbm [shape: f32[8,128], index: 4, kind: output, shape index: {}]  }
   0x1   :  { %10 = vsyncpa [#allocation6], 0 }
   0x2   :  { %11 = vsyncpa [#allocation4], 0  ;;  %s180_s15 = smov [#allocation2]   ;;  %s181_s17 = smov [#allocation5]  }
   0x3   :  { %s18_s16 = sshll.u32 %s180_s15, 4  ;;  %s28_s18 = sshll.u32 %s181_s17, 4  ;;  %s19_s16 = int_to_ptr.vmem [resolvable:$true] %s18_s16  ;;  %s29_s18 = int_to_ptr.vmem [resolvable:$true] %s28_s18 }
   0x4   :  { %s122_s19 = scalar_lea.vmem %s19_s16, 32  ;;  %p127_p1 = scmp.lt.s32.totalorder %s19_s16, %s19_s16 }
   0x5   :  { %p123_p0 = scmp.ne.s32.totalorder %s19_s16, %s122_s19  ;;  %p128_p2 = scmp.lt.s32.totalorder %s122_s19, %s122_s19 }
   0x7   :  { %p129_p3 = por %p128_p2, %p127_p1 }
   0x9   :  { %p130_p4 = pnand %p129_p3, %p123_p0 }
   0xb   :  { %133 = shalt.err (!%p130_p4)
}
   0xc   :  { %21 = dma.hbm_to_vmem [thread:$0]  %s223_s0, 32, %s19_s16, [#allocation3]  }
   0xd   :  { %s142_s22 = scalar_lea.vmem %s29_s18, 32  ;;  %p147_p6 = scmp.lt.s32.totalorder %s29_s18, %s29_s18 }
   0xe   :  { %p143_p5 = scmp.ne.s32.totalorder %s29_s18, %s142_s22  ;;  %p148_p7 = scmp.lt.s32.totalorder %s142_s22, %s142_s22 }
  0x10   :  { %p149_p8 = por %p148_p7, %p147_p6 }
  0x12   :  { %p150_p9 = pnand %p149_p8, %p143_p5 }
  0x14   :  { %153 = shalt.err (!%p150_p9)
}
  0x15   :  { %31 = dma.hbm_to_vmem [thread:$0]  %s224_s1, 32, %s29_s18, [#allocation6]  }
  0x16   :  { %174 = dma.done.wait [#allocation3], 32  }
  0x17   :  { %175 = vsyncadd [#allocation3], 4294967264 }
  0x18   :  { %176 = dma.done.wait [#allocation6], 32  }
  0x19   :  { %177 = vsyncadd [#allocation6], 4294967264  ;;  %v51_v0 = vld [vmem:[%s225_s2] sm:$0x3]  ;;  %v43_v4 = vld [vmem:[#allocation5] sm:$0x3]  ;;  %v70_v31 = vlaneseq }
  0x1a   :  { %v52_v1 = vld [vmem:[%s226_s3] sm:$0x3]  ;;  %vm47_vm0 = vcmask 254976   ;;  %vm77_vm3 = vcmask 1024   ;;  %s182_s1 = smov [#allocation7]  }
  0x1b   :  { %v42_v2 = vld [vmem:[#allocation2] sm:$0x3]  ;;  %v53_v3 = vsub.f32 %v51_v0, %v52_v1  ;;  %v71_v32 = vshrl.u32 %v70_v31, 7  ;;  %v73_v33 = vand.u32 127, %v70_v31  ;;  %s97_s2 = sshll.u32 %s182_s1, 4  ;;  %s98_s2 = int_to_ptr.vmem [resolvable:$true] %s97_s2 }
  0x1c   :  { %v44_v5 = vsub.f32 %v42_v2, %v43_v4  ;;  %s154_s28 = scalar_lea.vmem %s98_s2, 128  ;;  %p159_p11 = scmp.lt.s32.totalorder %s98_s2, %s98_s2 }
  0x1d   :  { %v54_v6 = vadd.f32 1e-06, %v53_v3  ;;  %vm74_vm4 = vcmp.eq.s32.totalorder %v71_v32, 0  ;;  %vm75_vm5 = vcmp.eq.s32.totalorder %v73_v33, 0  ;;  %p155_p10 = scmp.ne.s32.totalorder %s98_s2, %s154_s28  ;;  %p160_p12 = scmp.lt.s32.totalorder %s154_s28, %s154_s28 }
  0x1e   :  { %v45_v7 = vadd.f32 1e-06, %v44_v5  ;;  %vm76_vm6 = vmand %vm74_vm4, %vm75_vm5 }
  0x1f   :  { %v55_v8 = vmul.f32 %v54_v6, %v54_v6  ;;  %p161_p13 = por %p160_p12, %p159_p11 }
  0x20   :  { %v46_v9 = vmul.f32 %v45_v7, %v45_v7 }
  0x21   :  { %v56_v10 = vsel %vm47_vm0, %v55_v8, 0.0  ;;  %p162_p0 = pnand %p161_p13, %p155_p10 }
  0x22   :  { %57 = vadd.xlane.f32.xlu0 %v56_v10  ;;  %v48_v11 = vsel %vm47_vm0, %v46_v9, 0.0 }
  0x26   :  { %49 = vadd.xlane.f32.xlu0 %v48_v11 }
  0xab   :  { %v58_v12 = vpop.xlane.xlu0 %57 }
  0xac   :  { %112 = vrsqrt.f32 %v58_v12  ;;  %vm61_vm1 = vcmp.eq.f32.partialorder %v58_v12, inf  ;;  %v64_v15 = vand.u32 2147483648, %v58_v12  ;;  %vm63_vm2 = vcmp.eq.f32.partialorder %v58_v12, 0.0 }
  0xaf   :  { %v50_v20 = vpop.xlane.xlu0 %49 }
  0xb9   :  { %v113_v13 = vpop.eup %112 }
  0xba   :  { %v60_v14 = vmul.f32 %v113_v13, %v58_v12 }
  0xbc   :  { %v62_v16 = vsel %vm61_vm1, %v58_v12, %v60_v14 }
  0xbd   :  { %v65_v17 = vsel %vm63_vm2, %v64_v15, %v62_v16 }
  0xbe   :  { %v66_v18 = vsub.f32 1.0, %v65_v17 }
  0xc0   :  { %v67_v19 = vmax.f32 %v66_v18, 0.0 }
  0xc2   :  { %v68_v21 = vmul.f32 %v67_v19, %v67_v19 }
  0xc4   :  { %v69_v22 = vadd.f32 %v68_v21, %v50_v20 }
  0xc6   :  { %v78_v23 = vsel %vm77_vm3, %v69_v22, 0.0 }
  0xc7   :  { %79 = vadd.xlane.f32.xlu1 %v78_v23 }
 0x150   :  { %v80_v24 = vpop.xlane.xlu1 %79 }
 0x151   :  { %v81_v25 = vrot.slane %v80_v24, 4 }
 0x153   :  { %v82_v26 = vadd.f32 %v81_v25, %v80_v24 }
 0x155   :  { %v83_v27 = vrot.slane %v82_v26, 2 }
 0x157   :  { %v84_v28 = vadd.f32 %v83_v27, %v82_v26 }
 0x159   :  { %v85_v29 = vrot.slane %v84_v28, 1 }
 0x15b   :  { %v86_v30 = vadd.f32 %v85_v29, %v84_v28 }
 0x15d   :  { %107 = vpush %v86_v30 }
 0x18e   :  { %s108_s3 = spop %107 }
 0x18f   :  { %v88_v34 = vstv %s108_s3 }
 0x190   :  { %v89_v35 = vsel %vm76_vm6, %v88_v34, 0.0 }
 0x191   :  { %90 = vst [vmem:[#allocation7] sm:$0xff] %v89_v35 }
 0x192   :  { %165 = shalt.err (!%p162_p0)
}
 0x193   :  { %100 = dma.vmem_to_hbm [thread:$0]  %s98_s2, 128, %s227_s4, [#allocation4]  }
 0x194   :  { %178 = dma.done.wait [#allocation4], 128  }
 0x195   :  { %179 = vsyncadd [#allocation4], 4294967168 }
 0x196   :  { %104 = vsyncpa [#allocation3], 1 }
 0x197   :  { %105 = vsyncpa [#allocation6], 1 }
 0x198   :  { %106 = vsyncpa [#allocation4], 1 }

</bundles_post_ra>
